<compile_context>
chip_gen: v7x
topology: tpu7x:2x2x1
jax: 0.10.0
libtpu: 0.0.40
codegen_flags: <defaults>
</compile_context>

<pallas_src>
import functools

import jax
import jax.numpy as jnp
from jax.experimental import pallas as pl
from jax.experimental.pallas import tpu as pltpu


def _mlp_epilogue(h, w2_row, b2):
    # h: [TB, H] f32 (post-ReLU); w2_row: [1, H] f32; b2: f32 scalar.
    # fc2 as a VPU multiply + cross-lane (XLU) reduce; avoids an N=1 MXU op.
    y = jnp.sum(h * w2_row, axis=-1) + b2
    # Numerically-stable sigmoid: exp and approx reciprocal both ride the EUP.
    z = jnp.exp(-jnp.abs(y))
    inv = pl.reciprocal(1.0 + z, approx=True)
    sig = jnp.where(y >= 0.0, inv, z * inv)
    return (4.0 * sig + 1.0)[None, :]                 # lane-dense [1, TB]


def _recnn_fused_kernel(uidx_ref, iidx_ref, utab_ref, itab_ref, w1_ref,
                        b1_ref, w2_ref, b2_ref, out_ref):
    # uidx_ref/iidx_ref: [TB, 1] int32 batch-tile index columns
    # utab_ref: [NU, E] bf16, itab_ref: [NI, E] bf16 (resident)
    # w1_ref: [2E, H] bf16 (resident); b1_ref/w2_ref: [1, H] f32
    # b2_ref: [1] f32 (SMEM); out_ref: [1, TB] f32
    tb = uidx_ref.shape[0]
    nu, e = utab_ref.shape
    ni = itab_ref.shape[0]

    # In-kernel embedding gather via one-hot MXU matmuls (exact: bf16 rows
    # pass through the f32 accumulator unchanged).
    oh_u = (jax.lax.broadcasted_iota(jnp.int32, (tb, nu), 1)
            == uidx_ref[...]).astype(jnp.bfloat16)
    oh_i = (jax.lax.broadcasted_iota(jnp.int32, (tb, ni), 1)
            == iidx_ref[...]).astype(jnp.bfloat16)
    xu = jnp.dot(oh_u, utab_ref[...],
                 preferred_element_type=jnp.float32).astype(jnp.bfloat16)
    xi = jnp.dot(oh_i, itab_ref[...],
                 preferred_element_type=jnp.float32).astype(jnp.bfloat16)

    # fc1: concat(user, item) @ W1 == xu @ W1[:E] + xi @ W1[E:] (static slices).
    h = (jnp.dot(xu, w1_ref[:e, :], preferred_element_type=jnp.float32)
         + jnp.dot(xi, w1_ref[e:, :], preferred_element_type=jnp.float32))
    h = jnp.maximum(h + b1_ref[...], 0.0)
    out_ref[...] = _mlp_epilogue(h, w2_ref[...], b2_ref[0])


def _recnn_mlp_kernel(x_ref, w1_ref, b1_ref, w2_ref, b2_ref, out_ref):
    # Fallback for large tables: x pre-gathered in JAX.
    # x_ref: [TB, 2E] bf16; w1_ref: [2E, H] bf16.
    h = jnp.dot(x_ref[...], w1_ref[...], preferred_element_type=jnp.float32)
    h = jnp.maximum(h + b1_ref[...], 0.0)
    out_ref[...] = _mlp_epilogue(h, w2_ref[...], b2_ref[0])


def _pick_batch_tile(batch):
    """Large tiles amortize the ~0.35us per-grid-step overhead.  Keep TB a
    multiple of 128 lanes whenever the grid has >1 step (lane-dense output
    block stays aligned) and take >=2 steps when the batch allows so v7x's
    two TensorCores both get work."""
    if batch <= 128:
        return max(8, -(-batch // 8) * 8)            # single tile
    half = -(-batch // 2)
    return min(4096, -(-half // 128) * 128)


_COMPILER_PARAMS = pltpu.CompilerParams(
    dimension_semantics=("parallel",),        # batch grid: shard across v7x's 2 TCs
    vmem_limit_bytes=32 * 1024 * 1024,        # lift v5e's 16 MiB scoped default
)


def recommendation_nn_forward(user, item, params, fuse_gather=None):
    """Forward pass matching the PyTorch RecommendationNN module."""
    utab = params["user_embedding"]           # [NU, E]  bf16
    itab = params["item_embedding"]           # [NI, E]  bf16
    w1 = params["fc1_w"]                      # [2E, H]  bf16 (torch fc1.weight.T)
    b1 = params["fc1_b"]                      # [H]      f32
    w2 = params["fc2_w"]                      # [H]      f32 (torch fc2.weight[0])
    b2 = params["fc2_b"]                      # [1]      f32

    nu, e = utab.shape
    ni = itab.shape[0]
    two_e, hid = w1.shape
    batch = user.shape[0]

    tb = _pick_batch_tile(batch)
    g = pl.cdiv(batch, tb)
    bp = g * tb

    b1_2d = b1.reshape(1, hid).astype(jnp.float32)
    w2_2d = w2.reshape(1, hid).astype(jnp.float32)
    b2_1d = b2.reshape(1).astype(jnp.float32)

    # Pad only the tiny int32 index vectors (never x) up to a tile multiple;
    # index 0 is valid so padded lanes compute finite garbage and get sliced off.
    user_p = jnp.pad(user.astype(jnp.int32), (0, bp - batch))
    item_p = jnp.pad(item.astype(jnp.int32), (0, bp - batch))

    if fuse_gather is None:
        # Fuse the gather when both tables comfortably fit in VMEM.
        fuse_gather = max(nu, ni) <= 512

    if fuse_gather:
        out = pl.pallas_call(
            _recnn_fused_kernel,
            out_shape=jax.ShapeDtypeStruct((1, bp), jnp.float32),
            grid=(g,),
            in_specs=[
                pl.BlockSpec((tb, 1), lambda i: (i, 0)),       # user idx tile
                pl.BlockSpec((tb, 1), lambda i: (i, 0)),       # item idx tile
                pl.BlockSpec((nu, e), lambda i: (0, 0)),       # user table (resident)
                pl.BlockSpec((ni, e), lambda i: (0, 0)),       # item table (resident)
                pl.BlockSpec((two_e, hid), lambda i: (0, 0)),  # fc1 weight (resident)
                pl.BlockSpec((1, hid), lambda i: (0, 0)),      # fc1 bias (resident)
                pl.BlockSpec((1, hid), lambda i: (0, 0)),      # fc2 weight row
                pl.BlockSpec(memory_space=pltpu.MemorySpace.SMEM),  # fc2 bias
            ],
            out_specs=pl.BlockSpec((1, tb), lambda i: (0, i)),  # lane-dense output
            compiler_params=_COMPILER_PARAMS,
        )(user_p.reshape(bp, 1), item_p.reshape(bp, 1),
          utab, itab, w1, b1_2d, w2_2d, b2_1d)
    else:
        # TODO(synk): large-table path still materializes x once in HBM; a
        # per-row DMA gather driven by scalar-prefetched indices would remove it.
        x = jnp.concatenate([utab[user_p], itab[item_p]], axis=1)   # [bp, 2E] bf16
        out = pl.pallas_call(
            _recnn_mlp_kernel,
            out_shape=jax.ShapeDtypeStruct((1, bp), jnp.float32),
            grid=(g,),
            in_specs=[
                pl.BlockSpec((tb, two_e), lambda i: (i, 0)),    # batch tile
                pl.BlockSpec((two_e, hid), lambda i: (0, 0)),   # fc1 weight (resident)
                pl.BlockSpec((1, hid), lambda i: (0, 0)),       # fc1 bias
                pl.BlockSpec((1, hid), lambda i: (0, 0)),       # fc2 weight row
                pl.BlockSpec(memory_space=pltpu.MemorySpace.SMEM),  # fc2 bias
            ],
            out_specs=pl.BlockSpec((1, tb), lambda i: (0, i)),
            compiler_params=_COMPILER_PARAMS,
        )(x, w1, b1_2d, w2_2d, b2_1d)

    return out.reshape(-1)[:batch]                               # matches x.view(-1)


def _reference_forward(user, item, params):
    """Pure-JAX reference (params already hold the bf16-rounded operands)."""
    ue = params["user_embedding"][user].astype(jnp.float32)
    ie = params["item_embedding"][item].astype(jnp.float32)
    x = jnp.concatenate([ue, ie], axis=1)
    w1 = params["fc1_w"].astype(jnp.float32)
    hidden = jnp.maximum(x @ w1 + params["fc1_b"][None, :], 0.0)
    y = hidden @ params["fc2_w"] + params["fc2_b"][0]
    return 4.0 * jax.nn.sigmoid(y) + 1.0


def init_params(key, num_users, num_items, embedding_size, hidden_size):
    """Deterministic synthetic parameters, stored directly in kernel layout
    and dtype (bf16 MXU operands hoisted out of the per-call path)."""
    k = jax.random.split(key, 6)
    return {
        "user_embedding": jax.random.normal(
            k[0], (num_users, embedding_size), jnp.float32).astype(jnp.bfloat16),
        "item_embedding": jax.random.normal(
            k[1], (num_items, embedding_size), jnp.float32).astype(jnp.bfloat16),
        # fc1 weight stored as [2E, H] (torch Linear weight transposed), bf16.
        "fc1_w": (0.05 * jax.random.normal(
            k[2], (2 * embedding_size, hidden_size), jnp.float32)
                  ).astype(jnp.bfloat16),
        "fc1_b": 0.05 * jax.random.normal(k[3], (hidden_size,), jnp.float32),
        # fc2 weight stored as [H] row (torch fc2.weight[0]).
        "fc2_w": 0.05 * jax.random.normal(k[4], (hidden_size,), jnp.float32),
        "fc2_b": 0.05 * jax.random.normal(k[5], (1,), jnp.float32),
    }


if __name__ == "__main__":
    embedding_size = 64
    hidden_size = 128
    num_users = 16
    num_items = 32
    batch = 8

    key = jax.random.PRNGKey(0)
    pkey, ukey, ikey = jax.random.split(key, 3)
    params = init_params(pkey, num_users, num_items, embedding_size, hidden_size)

    user = jax.random.randint(ukey, (batch,), 0, num_users, dtype=jnp.int32)
    item = jax.random.randint(ikey, (batch,), 0, num_items, dtype=jnp.int32)

    ref = _reference_forward(user, item, params)

    # Primary path: fused in-kernel embedding gather (small tables).
    fwd_fused = jax.jit(functools.partial(recommendation_nn_forward, fuse_gather=True))
    out = fwd_fused(user, item, params)
    jax.block_until_ready(out)
    assert out.shape == (batch,)
    err = float(jnp.max(jnp.abs(out - ref)))
    assert err < 1e-2, f"fused kernel mismatch vs reference: {err}"
    # Output of 4*sigmoid(x)+1 lies in [1, 5]; tiny slack for approx reciprocal.
    assert bool(jnp.all(out > 1.0 - 1e-2)) and bool(jnp.all(out < 5.0 + 1e-2))

    # Fallback path (large tables): JAX gather + plain MLP kernel.
    fwd_plain = jax.jit(functools.partial(recommendation_nn_forward, fuse_gather=False))
    out2 = fwd_plain(user, item, params)
    jax.block_until_ready(out2)
    err2 = float(jnp.max(jnp.abs(out2 - ref)))
    assert err2 < 1e-2, f"fallback kernel mismatch vs reference: {err2}"

    print("KERNEL_OK")
</pallas_src>

<mosaic_0001>
module attributes {stable_mosaic.version = 11 : i64} {
  func.func @_recnn_fused_kernel(%arg0: i32, %arg1: memref<8x1xi32, #tpu.memory_space<vmem>>, %arg2: memref<8x1xi32, #tpu.memory_space<vmem>>, %arg3: memref<16x64xbf16, #tpu.memory_space<vmem>>, %arg4: memref<32x64xbf16, #tpu.memory_space<vmem>>, %arg5: memref<128x128xbf16, #tpu.memory_space<vmem>>, %arg6: memref<1x128xf32, #tpu.memory_space<vmem>>, %arg7: memref<1x128xf32, #tpu.memory_space<vmem>>, %arg8: memref<1xf32, #tpu.memory_space<smem>>, %arg9: memref<1x8xf32, #tpu.memory_space<vmem>>) attributes {dimension_semantics = [#tpu.dimension_semantics<parallel>], iteration_bounds = array<i64: 1>, scalar_prefetch = 0 : i64, scratch_operands = 0 : i64, tpu.core_type = #tpu.core_type<tc>, window_params = [{transform_indices = @transform_0, window_bounds = array<i64: 8, 1>}, {transform_indices = @transform_1, window_bounds = array<i64: 8, 1>}, {pipeline_mode = #tpu.pipeline_mode<synchronous>, transform_indices = @transform_2, window_bounds = array<i64: 16, 64>}, {pipeline_mode = #tpu.pipeline_mode<synchronous>, transform_indices = @transform_3, window_bounds = array<i64: 32, 64>}, {pipeline_mode = #tpu.pipeline_mode<synchronous>, transform_indices = @transform_4, window_bounds = array<i64: 128, 128>}, {pipeline_mode = #tpu.pipeline_mode<synchronous>, transform_indices = @transform_5, window_bounds = array<i64: 1, 128>}, {pipeline_mode = #tpu.pipeline_mode<synchronous>, transform_indices = @transform_6, window_bounds = array<i64: 1, 128>}, {transform_indices = @transform_7, window_bounds = array<i64: 1>}, {transform_indices = @transform_8, window_bounds = array<i64: 1, 8>}]} {
    %0 = tpu.iota {dimensions = array<i32: 1>} : vector<8x16xi32>
    %c0 = arith.constant 0 : index
    %c0_0 = arith.constant 0 : index
    %1 = vector.load %arg1[%c0, %c0_0] : memref<8x1xi32, #tpu.memory_space<vmem>>, vector<8x1xi32>
    %2 = vector.broadcast %1 : vector<8x1xi32> to vector<8x16xi32>
    %3 = arith.cmpi eq, %0, %2 : vector<8x16xi32>
    %4 = arith.extui %3 : vector<8x16xi1> to vector<8x16xi32>
    %5 = arith.sitofp %4 : vector<8x16xi32> to vector<8x16xf32>
    %6 = arith.truncf %5 : vector<8x16xf32> to vector<8x16xbf16>
    %7 = tpu.iota {dimensions = array<i32: 1>} : vector<8x32xi32>
    %c0_1 = arith.constant 0 : index
    %c0_2 = arith.constant 0 : index
    %8 = vector.load %arg2[%c0_1, %c0_2] : memref<8x1xi32, #tpu.memory_space<vmem>>, vector<8x1xi32>
    %9 = vector.broadcast %8 : vector<8x1xi32> to vector<8x32xi32>
    %10 = arith.cmpi eq, %7, %9 : vector<8x32xi32>
    %11 = arith.extui %10 : vector<8x32xi1> to vector<8x32xi32>
    %12 = arith.sitofp %11 : vector<8x32xi32> to vector<8x32xf32>
    %13 = arith.truncf %12 : vector<8x32xf32> to vector<8x32xbf16>
    %c0_3 = arith.constant 0 : index
    %c0_4 = arith.constant 0 : index
    %14 = vector.load %arg3[%c0_3, %c0_4] : memref<16x64xbf16, #tpu.memory_space<vmem>>, vector<16x64xbf16>
    %cst = arith.constant dense<0.000000e+00> : vector<8x64xf32>
    %15 = tpu.matmul %6, %14, %cst {dimension_numbers = #tpu.dot_dimension_numbers<[1], [0], [0], [1], [0, 0, 1, 1], [], []>} : vector<8x16xbf16>, vector<16x64xbf16>, vector<8x64xf32> -> vector<8x64xf32>
    %16 = arith.truncf %15 : vector<8x64xf32> to vector<8x64xbf16>
    %c0_5 = arith.constant 0 : index
    %c0_6 = arith.constant 0 : index
    %17 = vector.load %arg4[%c0_5, %c0_6] : memref<32x64xbf16, #tpu.memory_space<vmem>>, vector<32x64xbf16>
    %cst_7 = arith.constant dense<0.000000e+00> : vector<8x64xf32>
    %18 = tpu.matmul %13, %17, %cst_7 {dimension_numbers = #tpu.dot_dimension_numbers<[1], [0], [0], [1], [0, 0, 1, 1], [], []>} : vector<8x32xbf16>, vector<32x64xbf16>, vector<8x64xf32> -> vector<8x64xf32>
    %19 = arith.truncf %18 : vector<8x64xf32> to vector<8x64xbf16>
    %c0_8 = arith.constant 0 : index
    %c0_9 = arith.constant 0 : index
    %20 = vector.load %arg5[%c0_8, %c0_9] : memref<128x128xbf16, #tpu.memory_space<vmem>>, vector<64x128xbf16>
    %cst_10 = arith.constant dense<0.000000e+00> : vector<8x128xf32>
    %21 = tpu.matmul %16, %20, %cst_10 {dimension_numbers = #tpu.dot_dimension_numbers<[1], [0], [0], [1], [0, 0, 1, 1], [], []>} : vector<8x64xbf16>, vector<64x128xbf16>, vector<8x128xf32> -> vector<8x128xf32>
    %c64 = arith.constant 64 : index
    %c0_11 = arith.constant 0 : index
    %22 = vector.load %arg5[%c64, %c0_11] : memref<128x128xbf16, #tpu.memory_space<vmem>>, vector<64x128xbf16>
    %cst_12 = arith.constant dense<0.000000e+00> : vector<8x128xf32>
    %23 = tpu.matmul %19, %22, %cst_12 {dimension_numbers = #tpu.dot_dimension_numbers<[1], [0], [0], [1], [0, 0, 1, 1], [], []>} : vector<8x64xbf16>, vector<64x128xbf16>, vector<8x128xf32> -> vector<8x128xf32>
    %24 = arith.addf %21, %23 : vector<8x128xf32>
    %c0_13 = arith.constant 0 : index
    %c0_14 = arith.constant 0 : index
    %25 = vector.load %arg6[%c0_13, %c0_14] : memref<1x128xf32, #tpu.memory_space<vmem>>, vector<1x128xf32>
    %26 = vector.broadcast %25 : vector<1x128xf32> to vector<8x128xf32>
    %27 = arith.addf %24, %26 : vector<8x128xf32>
    %cst_15 = arith.constant 0.000000e+00 : f32
    %28 = vector.broadcast %cst_15 : f32 to vector<8x128xf32>
    %29 = arith.maximumf %27, %28 : vector<8x128xf32>
    %c0_16 = arith.constant 0 : index
    %c0_17 = arith.constant 0 : index
    %30 = vector.load %arg7[%c0_16, %c0_17] : memref<1x128xf32, #tpu.memory_space<vmem>>, vector<1x128xf32>
    %c0_18 = arith.constant 0 : index
    %31 = memref.load %arg8[%c0_18] : memref<1xf32, #tpu.memory_space<smem>>
    %32 = vector.broadcast %30 : vector<1x128xf32> to vector<8x128xf32>
    %33 = arith.mulf %29, %32 : vector<8x128xf32>
    %cst_19 = arith.constant dense<0.000000e+00> : vector<8xf32>
    %34 = vector.multi_reduction <add>, %33, %cst_19 [1] : vector<8x128xf32> to vector<8xf32>
    %35 = vector.broadcast %31 : f32 to vector<8xf32>
    %36 = arith.addf %34, %35 : vector<8xf32>
    %37 = math.absf %36 : vector<8xf32>
    %cst_20 = arith.constant 0.000000e+00 : f32
    %38 = vector.broadcast %cst_20 : f32 to vector<8xf32>
    %39 = arith.subf %38, %37 : vector<8xf32>
    %40 = math.exp %39 : vector<8xf32>
    %cst_21 = arith.constant 1.000000e+00 : f32
    %41 = vector.broadcast %cst_21 : f32 to vector<8xf32>
    %42 = arith.addf %41, %40 : vector<8xf32>
    %43 = tpu.reciprocal %42 {approx = true} : vector<8xf32> -> vector<8xf32>
    %cst_22 = arith.constant 0.000000e+00 : f32
    %44 = vector.broadcast %cst_22 : f32 to vector<8xf32>
    %45 = arith.cmpf oge, %36, %44 : vector<8xf32>
    %46 = arith.mulf %40, %43 : vector<8xf32>
    %47 = arith.select %45, %43, %46 : vector<8xi1>, vector<8xf32>
    %cst_23 = arith.constant 4.000000e+00 : f32
    %48 = vector.broadcast %cst_23 : f32 to vector<8xf32>
    %49 = arith.mulf %48, %47 : vector<8xf32>
    %cst_24 = arith.constant 1.000000e+00 : f32
    %50 = vector.broadcast %cst_24 : f32 to vector<8xf32>
    %51 = arith.addf %49, %50 : vector<8xf32>
    %52 = vector.shape_cast %51 : vector<8xf32> to vector<1x8xf32>
    %c0_25 = arith.constant 0 : index
    %c0_26 = arith.constant 0 : index
    %53 = vector.load %arg9[%c0_25, %c0_26] : memref<1x8xf32, #tpu.memory_space<vmem>>, vector<1x8xf32>
    tpu.vector_store %arg9[%c0_25, %c0_26], %52 {strides = array<i32>} : memref<1x8xf32, #tpu.memory_space<vmem>>, vector<1x8xf32>,
    return
  }
  func.func @transform_0(%arg0: i32) -> (i32, i32) {
    %c0_i32 = arith.constant 0 : i32
    %c0_i32_0 = arith.constant 0 : i32
    return %arg0, %c0_i32 : i32, i32
  }
  func.func @transform_1(%arg0: i32) -> (i32, i32) {
    %c0_i32 = arith.constant 0 : i32
    %c0_i32_0 = arith.constant 0 : i32
    return %arg0, %c0_i32 : i32, i32
  }
  func.func @transform_2(%arg0: i32) -> (i32, i32) {
    %c0_i32 = arith.constant 0 : i32
    %c0_i32_0 = arith.constant 0 : i32
    %c0_i32_1 = arith.constant 0 : i32
    return %c0_i32, %c0_i32_0 : i32, i32
  }
  func.func @transform_3(%arg0: i32) -> (i32, i32) {
    %c0_i32 = arith.constant 0 : i32
    %c0_i32_0 = arith.constant 0 : i32
    %c0_i32_1 = arith.constant 0 : i32
    return %c0_i32, %c0_i32_0 : i32, i32
  }
  func.func @transform_4(%arg0: i32) -> (i32, i32) {
    %c0_i32 = arith.constant 0 : i32
    %c0_i32_0 = arith.constant 0 : i32
    %c0_i32_1 = arith.constant 0 : i32
    return %c0_i32, %c0_i32_0 : i32, i32
  }
  func.func @transform_5(%arg0: i32) -> (i32, i32) {
    %c0_i32 = arith.constant 0 : i32
    %c0_i32_0 = arith.constant 0 : i32
    %c0_i32_1 = arith.constant 0 : i32
    return %c0_i32, %c0_i32_0 : i32, i32
  }
  func.func @transform_6(%arg0: i32) -> (i32, i32) {
    %c0_i32 = arith.constant 0 : i32
    %c0_i32_0 = arith.constant 0 : i32
    %c0_i32_1 = arith.constant 0 : i32
    return %c0_i32, %c0_i32_0 : i32, i32
  }
  func.func @transform_7(%arg0: i32) -> i32 {
    %c0_i32 = arith.constant 0 : i32
    %c0_i32_0 = arith.constant 0 : i32
    return %c0_i32 : i32
  }
  func.func @transform_8(%arg0: i32) -> (i32, i32) {
    %c0_i32 = arith.constant 0 : i32
    %c0_i32_0 = arith.constant 0 : i32
    return %c0_i32, %arg0 : i32, i32
  }
}

</mosaic_0001>

<bundles_post_ra>
// kernel: recommendation_nn_forward.1
= control target key start
LH: loop header
LB: loop body
LE: loop exit
PB: predicated region body
PF: predicated region fallthrough
CT: control target
= control target key end

     0   :  { %14 = vsyncpa [#allocation4], 0  ;;  %s639_s0 = inlined_call_operand.vmem [shape: s32[8,1], index: 0, kind: input, shape index: {}]   ;;  %s640_s1 = inlined_call_operand.vmem [shape: s32[8,1], index: 1, kind: input, shape index: {}]   ;;  %s641_s2 = inlined_call_operand.vmem [shape: bf16[16,64], index: 2, kind: input, shape index: {}]   ;;  %s642_s3 = inlined_call_operand.vmem [shape: bf16[32,64], index: 3, kind: input, shape index: {}]   ;;  %s643_s4 = inlined_call_operand.hbm [shape: bf16[128,128], index: 4, kind: input, shape index: {}]   ;;  %s644_s5 = inlined_call_operand.vmem [shape: f32[1,128], index: 5, kind: input, shape index: {}]   ;;  %s645_s6 = inlined_call_operand.vmem [shape: f32[1,128], index: 6, kind: input, shape index: {}]   ;;  %s646_s7 = inlined_call_operand.<no memory space> [shape: f32[1], index: 7, kind: input, shape index: {}]   ;;  %s647_s8 = inlined_call_operand.hbm [shape: f32[1,8], index: 8, kind: output, shape index: {}]  }
   0x1   :  { %15 = vsyncpa [#allocation5], 0  ;;  %s528_s27 = smov [#allocation3]   ;;  %s480_s9 = scalar_lea.hbm %s643_s4, 1024 }
   0x2   :  { %s29_s28 = sshll.u32 %s528_s27, 4  ;;  %p481_p0 = scmp.ne.s32.totalorder %s643_s4, %s480_s9  ;;  %s30_s28 = int_to_ptr.vmem [resolvable:$true] %s29_s28 }
   0x3   :  { %p484_p1 = scmp.lt.u32.totalorder %s480_s9, %s643_s4 }
   0x5   :  { %p486_p2 = pnand %p484_p1, %p481_p0 }
   0x7   :  { %489 = shalt.err (!%p486_p2)
}
   0x8   :  { %s490_s14 = scalar_lea.vmem %s30_s28, 1024  ;;  %p495_p4 = scmp.lt.s32.totalorder %s30_s28, %s30_s28 }
   0x9   :  { %p491_p3 = scmp.ne.s32.totalorder %s30_s28, %s490_s14  ;;  %p496_p5 = scmp.lt.s32.totalorder %s490_s14, %s490_s14 }
   0xb   :  { %p497_p6 = por %p496_p5, %p495_p4 }
   0xd   :  { %p498_p7 = pnand %p497_p6, %p491_p3 }
   0xf   :  { %501 = shalt.err (!%p498_p7)
}
  0x10   :  { %s529_s15 = smov 64   ;;  %s530_s16 = smov 4  }
  0x11   :  { %35 = dma.hbm_to_vmem [thread:$0]  %s643_s4, 1024, %s30_s28, [#allocation4], %s529_s15, %s529_s15, %s530_s16  }
  0x12   :  { %524 = dma.done.wait [#allocation4], 1024  }
  0x13   :  { %525 = vsyncadd [#allocation4], 4294966272  ;;  %v531_v0 = vmov 0   ;;  %v532_v1 = vmov 0.0   ;;  %v48_v2 = vld [vmem:[%s639_s0] sm:$0xff]  ;;  %vm533_vm0 = vmmov 0   ;;  %v46_v7 = vlaneseq }
  0x14   :  { %464 = vset.pattern.permute.xlu0 %v531_v0  ;;  %419 = vmatprep.subr.bf16.mxu0 %v532_v1  ;;  %v56_v3 = vld [vmem:[%s640_s1] sm:$0xff]  ;;  %v467_v6 = vld [vmem:[%s642_s3 + $0x8] sm:$0xff]   ;;  %vm72_vm2 = vcmask 130048   ;;  %vm133_vm4 = vcmask 261120   ;;  %v472_v19 = vld [vmem:[#allocation3 + $0x10] sm:$0xff]   ;;  %vm218_vm5 = vcmask 523264   ;;  %v349_v47 = vstv %s646_s7 }
  0x15   :  { %425 = vmatprep.subr.bf16.mxu1 %v532_v1  ;;  %50 = vperm.xlu0 %464, %v48_v2   ;;  %v465_v4 = vld [vmem:[%s641_s2] sm:$0xff]   ;;  %v610_v8 = vand.u32 127, %v46_v7  ;;  %v471_v16 = vld [vmem:[#allocation3 + $0x28] sm:$0xff]   ;;  %v473_v20 = vld [vmem:[#allocation3 + $0x30] sm:$0xff]   ;;  %v364_v56 = vshrl.u32 %v46_v7, 7  ;;  %vm368_vm7 = vcmask 57344  }
  0x16   :  { %v466_v5 = vld [vmem:[%s642_s3] sm:$0xff]   ;;  %420 = vmatpush3.bf16.msra.mxu0 %v465_v4  ;;  %421 = vmatprep.mubr.msk.bf16.mxu0 %vm533_vm0, %v532_v1  ;;  %v470_v18 = vld [vmem:[#allocation3 + $0x8] sm:$0xff]   ;;  %v474_v21 = vld [vmem:[#allocation3 + $0x18] sm:$0xff]  }
  0x17   :  { %426 = vmatpush3.bf16.msra.mxu1 %v466_v5  ;;  %429 = vmatprep.mubr.msk.bf16.mxu1 %vm533_vm0, %v532_v1  ;;  %v469_v11 = vld [vmem:[#allocation3 + $0x20] sm:$0xff]   ;;  %v475_v22 = vld [vmem:[#allocation3 + $0x38] sm:$0xff]   ;;  %v365_v60 = vsub.s32 %v610_v8, %v364_v56 }
  0x18   :  { %427 = vmatprep.subr.bf16.mxu1 %v532_v1  ;;  %433 = vmatprep.subr.bf16.mxu0 %v532_v1  ;;  %v468_v15 = vld [vmem:[#allocation3] sm:$0xff]  }
  0x19   :  { %58 = vperm.xlu0 %464, %v56_v3   ;;  %v402_v38 = vld [vmem:[%s644_s5] ss:$0 sm:$0xff]  ;;  %s534_s5 = smov [#allocation6]  }
  0x1a   :  { %v403_v44 = vld [vmem:[%s645_s6] ss:$0 sm:$0xff]  ;;  %s376_s6 = sshll.u32 %s534_s5, 4  ;;  %s377_s6 = int_to_ptr.vmem [resolvable:$true] %s376_s6 }
  0x1b   :  { %428 = vmatpush3.bf16.msra.mxu1 %v467_v6  ;;  %s502_s7 = scalar_lea.vmem %s377_s6, 16  ;;  %s506_s30 = scalar_lea.vmem %s377_s6, 32 }
  0x1c   :  { %445 = vmatprep.subr.bf16.mxu1 %v532_v1  ;;  %p503_p8 = scmp.ne.s32.totalorder %s377_s6, %s502_s7  ;;  %p507_p9 = scmp.lt.s32.totalorder %s377_s6, %s377_s6 }
  0x1d   :  { %p508_p10 = scmp.lt.s32.totalorder %s506_s30, %s502_s7 }
  0x1f   :  { %p509_p11 = por %p508_p10, %p507_p9 }
  0x21   :  { %p510_p12 = pnand %p509_p11, %p503_p8 }
  0x94   :  { %v51_v9 = vpop.permute.xlu0 %50 }
  0x95   :  { %vm52_vm1 = vcmp.eq.s32.totalorder %v610_v8, %v51_v9 }
  0x96   :  { %v385_v10 = vsel %vm52_vm1, 1.0, %v532_v1 }
  0x97   :  { %v55_v12 = vpack.c.bf16 %v385_v10, %v385_v10 }
  0x98   :  { %v59_v13 = vpop.permute.xlu0 %58 }
  0x99   :  { %vm60_vm3 = vcmp.eq.s32.totalorder %v610_v8, %v59_v13  ;;  %422 = vmatmul.mubr.msk.bf16.vlgmr.msra.gmra.mrb[0].mxu0 %vm72_vm2, %v55_v12 }
  0x9a   :  { %v386_v14 = vsel %vm60_vm3, 1.0, %v532_v1  ;;  %434 = vmatpush3.bf16.msra.mxu0 %v469_v11  ;;  %441 = vmatprep.mubr.msk.bf16.mxu0 %vm533_vm0, %v532_v1 }
  0x9b   :  { %v63_v17 = vpack.c.bf16 %v386_v14, %v386_v14  ;;  %435 = vmatprep.subr.bf16.mxu0 %v532_v1 }
  0x9d   :  { %430 = vmatmul.mubr.msk.bf16.vlgmr.msra.gmra.mrb[0].mxu1 %vm133_vm4, %v63_v17 }
  0x9e   :  { %446 = vmatpush3.bf16.msra.mxu1 %v468_v15  ;;  %436 = vmatpush3.bf16.msra.mxu0 %v471_v16 }
  0x9f   :  { %447 = vmatprep.subr.bf16.mxu1 %v532_v1  ;;  %437 = vmatprep.subr.bf16.mxu0 %v532_v1 }
  0xa0   :  { %453 = vmatprep.mubr.msk.bf16.mxu1 %vm533_vm0, %v532_v1 }
  0xa2   :  { %448 = vmatpush3.bf16.msra.mxu1 %v470_v18  ;;  %438 = vmatpush3.bf16.msra.mxu0 %v473_v20 }
  0xa3   :  { %449 = vmatprep.subr.bf16.mxu1 %v532_v1  ;;  %439 = vmatprep.subr.bf16.mxu0 %v532_v1 }
  0xa6   :  { %450 = vmatpush3.bf16.msra.mxu1 %v472_v19  ;;  %440 = vmatpush3.bf16.msra.mxu0 %v475_v22 }
  0xa7   :  { %451 = vmatprep.subr.bf16.mxu1 %v532_v1 }
  0xaa   :  { %452 = vmatpush3.bf16.msra.mxu1 %v474_v21 }
 0x16c   :  { %v110_v23 = vpop.f32.mrb[0].mxu0 }
 0x16d   :  { %v116_v24 = vpack.c.bf16 %v110_v23, %v110_v23  ;;  %v423_v25 = vpop.f32.mrb[1].mxu0 }
 0x16e   :  { %v113_v26 = vpop.f32.mrb[2].mxu0 }
 0x16f   :  { %v424_v27 = vpop.f32.mrb[3].mxu0  ;;  %454 = vmatmul.mubr.msk.bf16.vlgmr.msra.gmra.mrb[4].mxu1 %vm218_vm5, %v116_v24 }
 0x170   :  { %v171_v28 = vpop.f32.mrb[0].mxu1 }
 0x171   :  { %v177_v29 = vpack.c.bf16 %v171_v28, %v171_v28  ;;  %v431_v30 = vpop.f32.mrb[1].mxu1 }
 0x172   :  { %v174_v31 = vpop.f32.mrb[2].mxu1 }
 0x173   :  { %v432_v32 = vpop.f32.mrb[3].mxu1  ;;  %442 = vmatmul.mubr.msk.bf16.vlgmr.msra.gmra.mrb[4].mxu0 %vm218_vm5, %v177_v29 }
 0x242   :  { %v323_v33 = vpop.f32.mrb[4].mxu1 }
 0x243   :  { %v455_v34 = vpop.f32.mrb[5].mxu1 }
 0x244   :  { %v326_v35 = vpop.f32.mrb[6].mxu1 }
 0x245   :  { %v456_v36 = vpop.f32.mrb[7].mxu1 }
 0x246   :  { %v256_v37 = vpop.f32.mrb[4].mxu0 }
 0x247   :  { %v324_v39 = vadd.f32 %v323_v33, %v256_v37  ;;  %v443_v40 = vpop.f32.mrb[5].mxu0 }
 0x248   :  { %v259_v41 = vpop.f32.mrb[6].mxu0 }
 0x249   :  { %v444_v42 = vpop.f32.mrb[7].mxu0  ;;  %v336_v43 = vadd.f32 %v402_v38, %v324_v39 }
 0x24b   :  { %v337_v45 = vmax.f32 %v336_v43, 0.0 }
 0x24d   :  { %v346_v46 = vmul.f32 %v403_v44, %v337_v45 }
 0x24f   :  { %347 = vadd.xlane.f32.xlu1 %v346_v46 }
 0x2dc   :  { %v348_v48 = vpop.xlane.xlu1 %347 }
 0x2dd   :  { %v350_v49 = vadd.f32 %v349_v47, %v348_v48 }
 0x2df   :  { %v351_v50 = vand.u32 2147483647, %v350_v49  ;;  %vm357_vm6 = vcmp.ge.f32.partialorder %v350_v49, 0.0 }
 0x2e1   :  { %v352_v51 = vsub.f32 0.0, %v351_v50 }
 0x2e3   :  { %v353_v52 = vmul.f32 1.442695, %v352_v51 }
 0x2e5   :  { %476 = vpow2.f32 %v353_v52 }
 0x2ef   :  { %v477_v53 = vpop.eup %476 }
 0x2f0   :  { %v355_v54 = vadd.f32 1.0, %v477_v53 }
 0x2f2   :  { %478 = vrcp.f32 %v355_v54 }
 0x2fc   :  { %v479_v55 = vpop.eup %478 }
 0x2fd   :  { %v358_v57 = vmul.f32 %v479_v55, %v477_v53 }
 0x2ff   :  { %v359_v58 = vsel %vm357_vm6, %v479_v55, %v358_v57 }
 0x300   :  { %v360_v59 = vmul.f32 4.0, %v359_v58 }
 0x302   :  { %v361_v61 = vadd.f32 1.0, %v360_v59 }
 0x304   :  { %v366_v62 = vrot.slane %v361_v61, %v365_v60 }
 0x306   :  { %369 = vst.msk [vmem:[#allocation6] sm:$0x1] %vm368_vm7, %v366_v62 }
 0x307   :  { %513 = shalt.err (!%p510_p12)
}
 0x308   :  { %s514_s11 = scalar_lea.hbm %s647_s8, 16 }
 0x309   :  { %p515_p13 = scmp.ne.s32.totalorder %s647_s8, %s514_s11  ;;  %p518_p0 = scmp.lt.u32.totalorder %s514_s11, %s647_s8 }
 0x30b   :  { %p520_p1 = pnand %p518_p0, %p515_p13 }
 0x30d   :  { %523 = shalt.err (!%p520_p1)
}
 0x30e   :  { %379 = dma.vmem_to_hbm [thread:$0]  %s377_s6, 16, %s647_s8, [#allocation5]  }
 0x30f   :  { %526 = dma.done.wait [#allocation5], 16  }
 0x310   :  { %527 = vsyncadd [#allocation5], 4294967280 }
 0x311   :  { %383 = vsyncpa [#allocation4], 1 }
 0x312   :  { %384 = vsyncpa [#allocation5], 1 }

</bundles_post_ra>
